<compile_context>
chip_gen: v7x
topology: tpu7x:2x2x1
jax: 0.10.0
libtpu: 0.0.40
codegen_flags: <defaults>
</compile_context>

<pallas_src>
import functools

import jax
import jax.numpy as jnp
from jax import lax
from jax.experimental import pallas as pl
from jax.experimental.pallas import tpu as pltpu


def _decoder_kernel(x_ref, w_ref, b_ref, o_ref):
    # x_ref: (TB, H, W, C) bf16   w_ref: (C, Vp) f32
    # b_ref: (1, Vp)       f32    o_ref: (TB, W, Vp) f32
    tb, hh, ww, cc = x_ref.shape

    def h_slice(i):
        # (TB, 1, W, C) -> (TB, W, C); running max kept in f32 (v5e VPU has no bf16 ALUs).
        return x_ref[:, pl.ds(i, 1), :, :].astype(jnp.float32).reshape(tb, ww, cc)

    def h_body(i, acc):
        return jnp.maximum(acc, h_slice(i))

    pooled = lax.fori_loop(1, hh, h_body, h_slice(0))          # (TB, W, C) f32

    # Fused (TB*W, C) @ (C, Vp) matmul, f32 accumulate on the MXU.
    # NOTE: keep W a multiple of 8 (f32 sublane) if W is ever tiled so this reshape stays
    # layout-free.
    lhs = pooled.reshape(tb * ww, cc)
    logits = jnp.dot(lhs, w_ref[...], preferred_element_type=jnp.float32)
    logits = logits + b_ref[...]                               # padded vocab columns get -1e30

    # log_softmax over the vocab (lane) axis, f32.
    m = jnp.max(logits, axis=-1, keepdims=True)
    shifted = logits - m
    lse = jnp.log(jnp.sum(jnp.exp(shifted), axis=-1, keepdims=True))
    o_ref[...] = (shifted - lse).reshape(tb, ww, -1).astype(o_ref.dtype)
    # TODO(synk): for very large TB*W (>~1024 rows) chunk the matmul + softmax epilogue over
    # ~256-row slabs to keep the f32 logits out of the spill path.


def _pick_batch_tile(B, H, W, C):
    """Largest TB s.t. the bf16 input block stays <= ~6 MiB (double-buffered fits v7x's 64 MiB
    VMEM; raise to ~12-16 MiB on v5e/v6e), M = TB*W stays modest, and the grid has >= 2 steps
    when B >= 2 (dual-TC v7x megacore)."""
    block_bytes_per_batch = H * W * C * 2            # bf16
    max_block_bytes = 6 << 20
    max_m_rows = 512
    tb = min(B,
             max(1, max_block_bytes // max(block_bytes_per_batch, 1)),
             max(1, max_m_rows // max(W, 1)))
    if B >= 2:
        tb = min(tb, -(-B // 2))                     # guarantee at least 2 grid steps
    return max(1, tb)


@functools.partial(jax.jit, static_argnames=("batch_tile", "channels_last_out"))
def decoder_forward(x, weight, bias, *, batch_tile=None, channels_last_out=False):
    """x: (B, C, H, W) f32 (PyTorch layout); weight: (C, V1) (= Conv2d weight (V1,C,1,1)
    transposed); bias: (V1,).  Returns (B, V1, W) f32 like the PyTorch module, or (B, W, V1)
    when channels_last_out=True (skips the final transpose pass)."""
    B, C, H, W = x.shape
    V1 = weight.shape[1]
    Vp = max(128, ((V1 + 127) // 128) * 128)         # lane-dense vocab padding

    # Fused (inside jit) into a single copy pass: NHWC + bf16 so C sits on the lane axis and
    # x is read by the kernel at 2 B/elem.  Ideally the producing layer emits this directly.
    x_nhwc = jnp.transpose(x, (0, 2, 3, 1)).astype(jnp.bfloat16)

    # Tiny, call-invariant parameters; f32 so the in-kernel dot is f32 x f32.
    # TODO(synk): hoist/cache w_pad/b_pad outside the per-call path when weight/bias are static.
    w_pad = jnp.zeros((C, Vp), jnp.float32).at[:, :V1].set(weight.astype(jnp.float32))
    b_pad = jnp.full((1, Vp), -1e30, jnp.float32).at[0, :V1].set(bias.astype(jnp.float32))

    if batch_tile is None:
        batch_tile = _pick_batch_tile(B, H, W, C)
    TB = max(1, min(int(batch_tile), B))
    num_blocks = -(-B // TB)                         # cdiv: no divisor constraint on B
    Bp = num_blocks * TB
    if Bp != B:                                      # zero-pad tail batch tile (sliced off below)
        x_nhwc = jnp.pad(x_nhwc, ((0, Bp - B), (0, 0), (0, 0), (0, 0)))

    out_bwv = pl.pallas_call(
        _decoder_kernel,
        out_shape=jax.ShapeDtypeStruct((Bp, W, Vp), jnp.float32),
        grid_spec=pltpu.PrefetchScalarGridSpec(
            num_scalar_prefetch=0,
            grid=(num_blocks,),
            in_specs=[
                pl.BlockSpec((TB, H, W, C), lambda b: (b, 0, 0, 0)),
                pl.BlockSpec((C, Vp), lambda b: (0, 0)),
                pl.BlockSpec((1, Vp), lambda b: (0, 0)),
            ],
            out_specs=pl.BlockSpec((TB, W, Vp), lambda b: (b, 0, 0)),
        ),
        compiler_params=pltpu.CompilerParams(
            dimension_semantics=("parallel",),
            vmem_limit_bytes=48 * 1024 * 1024,
        ),
    )(x_nhwc, w_pad, b_pad)

    out = out_bwv[:B, :, :V1]                        # drop batch + vocab padding (fused in jit)
    if channels_last_out:
        return out                                   # (B, W, V1)
    return jnp.transpose(out, (0, 2, 1))             # PyTorch (B, V1, W); fuses with the slice


def decoder_reference_f32(x, weight, bias):
    """Pure-JAX f32 reference of the PyTorch forward."""
    pooled = jnp.max(x, axis=2)                                         # (B, C, W)
    logits = jnp.einsum('bcw,cv->bvw', pooled, weight,
                        precision=lax.Precision.HIGHEST) + bias[None, :, None]
    return jax.nn.log_softmax(logits, axis=1)


def decoder_reference_bf16_rounded(x, weight, bias):
    """Reference with the same x->bf16 rounding as the kernel; all arithmetic in f32."""
    pooled = jnp.max(x.astype(jnp.bfloat16).astype(jnp.float32), axis=2)
    logits = jnp.einsum('bcw,cv->bvw', pooled, weight,
                        precision=lax.Precision.HIGHEST) + bias[None, :, None]
    return jax.nn.log_softmax(logits, axis=1)


if __name__ == "__main__":
    # The module fixes in_channels=256; keep spatial / vocab / batch small.
    B, C, H, W = 4, 256, 8, 16
    vocab_size = 31
    V1 = vocab_size + 1

    key = jax.random.PRNGKey(0)
    kx, kw, kb = jax.random.split(key, 3)

    x = jax.random.normal(kx, (B, C, H, W), dtype=jnp.float32)
    # Conv2d(256, V1, kernel_size=(1,1)) weight (V1, C, 1, 1) stored as (C, V1) for the matmul.
    weight = jax.random.normal(kw, (C, V1), dtype=jnp.float32) * 0.05
    bias = jax.random.normal(kb, (V1,), dtype=jnp.float32) * 0.05

    out = decoder_forward(x, weight, bias)
    out = jax.block_until_ready(out)
    assert out.shape == (B, V1, W)
    assert bool(jnp.all(jnp.isfinite(out)))

    ref_r = decoder_reference_bf16_rounded(x, weight, bias)
    assert jnp.allclose(out, ref_r, atol=1e-2, rtol=1e-2), "mismatch vs bf16-rounded reference"

    ref_f32 = decoder_reference_f32(x, weight, bias)
    assert jnp.allclose(out, ref_f32, atol=5e-2, rtol=5e-2), "mismatch vs f32 reference"

    print("KERNEL_OK")
</pallas_src>

<mosaic_0001>
module attributes {stable_mosaic.version = 11 : i64} {
  func.func @_decoder_kernel(%arg0: i32, %arg1: memref<2x8x16x256xbf16, #tpu.memory_space<vmem>>, %arg2: memref<256x128xf32, #tpu.memory_space<vmem>>, %arg3: memref<1x128xf32, #tpu.memory_space<vmem>>, %arg4: memref<2x16x128xf32, #tpu.memory_space<vmem>>) attributes {dimension_semantics = [#tpu.dimension_semantics<parallel>], iteration_bounds = array<i64: 2>, scalar_prefetch = 0 : i64, scratch_operands = 0 : i64, tpu.core_type = #tpu.core_type<tc>, window_params = [{transform_indices = @transform_0, window_bounds = array<i64: 2, 8, 16, 256>}, {pipeline_mode = #tpu.pipeline_mode<synchronous>, transform_indices = @transform_1, window_bounds = array<i64: 256, 128>}, {pipeline_mode = #tpu.pipeline_mode<synchronous>, transform_indices = @transform_2, window_bounds = array<i64: 1, 128>}, {transform_indices = @transform_3, window_bounds = array<i64: 2, 16, 128>}]} {
    %c0 = arith.constant 0 : index
    %c0_0 = arith.constant 0 : index
    %c0_1 = arith.constant 0 : index
    %c0_2 = arith.constant 0 : index
    %0 = vector.load %arg1[%c0, %c0_0, %c0_1, %c0_2] : memref<2x8x16x256xbf16, #tpu.memory_space<vmem>>, vector<2x1x16x256xbf16>
    %1 = arith.extf %0 : vector<2x1x16x256xbf16> to vector<2x1x16x256xf32>
    %2 = vector.shape_cast %1 : vector<2x1x16x256xf32> to vector<2x16x256xf32>
    %c1_i32 = arith.constant 1 : i32
    %c7_i32 = arith.constant 7 : i32
    %3 = arith.addi %c1_i32, %c7_i32 : i32
    %c1_i32_3 = arith.constant 1 : i32
    %4 = scf.for %arg5 = %c1_i32 to %3 step %c1_i32_3 iter_args(%arg6 = %2) -> (vector<2x16x256xf32>)  : i32 {
      %c0_14 = arith.constant 0 : index
      %23 = arith.index_cast %arg5 : i32 to index
      %c0_15 = arith.constant 0 : index
      %c0_16 = arith.constant 0 : index
      %24 = vector.load %arg1[%c0_14, %23, %c0_15, %c0_16] : memref<2x8x16x256xbf16, #tpu.memory_space<vmem>>, vector<2x1x16x256xbf16>
      %25 = arith.extf %24 : vector<2x1x16x256xbf16> to vector<2x1x16x256xf32>
      %26 = vector.shape_cast %25 : vector<2x1x16x256xf32> to vector<2x16x256xf32>
      %27 = arith.maximumf %arg6, %26 : vector<2x16x256xf32>
      scf.yield %27 : vector<2x16x256xf32>
    }
    %c7_i32_4 = arith.constant 7 : i32
    %5 = vector.shape_cast %4 : vector<2x16x256xf32> to vector<32x256xf32>
    %c0_5 = arith.constant 0 : index
    %c0_6 = arith.constant 0 : index
    %6 = vector.load %arg2[%c0_5, %c0_6] : memref<256x128xf32, #tpu.memory_space<vmem>>, vector<256x128xf32>
    %cst = arith.constant dense<0.000000e+00> : vector<32x128xf32>
    %7 = tpu.matmul %5, %6, %cst {dimension_numbers = #tpu.dot_dimension_numbers<[1], [0], [0], [1], [0, 0, 1, 1], [], []>} : vector<32x256xf32>, vector<256x128xf32>, vector<32x128xf32> -> vector<32x128xf32>
    %c0_7 = arith.constant 0 : index
    %c0_8 = arith.constant 0 : index
    %8 = vector.load %arg3[%c0_7, %c0_8] : memref<1x128xf32, #tpu.memory_space<vmem>>, vector<1x128xf32>
    %9 = vector.broadcast %8 : vector<1x128xf32> to vector<32x128xf32>
    %10 = arith.addf %7, %9 : vector<32x128xf32>
    %cst_9 = arith.constant dense<0xFF800000> : vector<32xf32>
    %11 = vector.multi_reduction <maximumf>, %10, %cst_9 [1] : vector<32x128xf32> to vector<32xf32>
    %12 = vector.shape_cast %11 : vector<32xf32> to vector<32x1xf32>
    %13 = vector.broadcast %12 : vector<32x1xf32> to vector<32x128xf32>
    %14 = arith.subf %10, %13 : vector<32x128xf32>
    %15 = math.exp %14 : vector<32x128xf32>
    %cst_10 = arith.constant dense<0.000000e+00> : vector<32xf32>
    %16 = vector.multi_reduction <add>, %15, %cst_10 [1] : vector<32x128xf32> to vector<32xf32>
    %17 = vector.shape_cast %16 : vector<32xf32> to vector<32x1xf32>
    %18 = math.log %17 : vector<32x1xf32>
    %19 = vector.broadcast %18 : vector<32x1xf32> to vector<32x128xf32>
    %20 = arith.subf %14, %19 : vector<32x128xf32>
    %21 = vector.shape_cast %20 : vector<32x128xf32> to vector<2x16x128xf32>
    %c0_11 = arith.constant 0 : index
    %c0_12 = arith.constant 0 : index
    %c0_13 = arith.constant 0 : index
    %22 = vector.load %arg4[%c0_11, %c0_12, %c0_13] : memref<2x16x128xf32, #tpu.memory_space<vmem>>, vector<2x16x128xf32>
    tpu.vector_store %arg4[%c0_11, %c0_12, %c0_13], %21 {strides = array<i32>} : memref<2x16x128xf32, #tpu.memory_space<vmem>>, vector<2x16x128xf32>,
    return
  }
  func.func @transform_0(%arg0: i32) -> (i32, i32, i32, i32) {
    %c0_i32 = arith.constant 0 : i32
    %c0_i32_0 = arith.constant 0 : i32
    %c0_i32_1 = arith.constant 0 : i32
    %c0_i32_2 = arith.constant 0 : i32
    return %arg0, %c0_i32, %c0_i32_0, %c0_i32_1 : i32, i32, i32, i32
  }
  func.func @transform_1(%arg0: i32) -> (i32, i32) {
    %c0_i32 = arith.constant 0 : i32
    %c0_i32_0 = arith.constant 0 : i32
    %c0_i32_1 = arith.constant 0 : i32
    return %c0_i32, %c0_i32_0 : i32, i32
  }
  func.func @transform_2(%arg0: i32) -> (i32, i32) {
    %c0_i32 = arith.constant 0 : i32
    %c0_i32_0 = arith.constant 0 : i32
    %c0_i32_1 = arith.constant 0 : i32
    return %c0_i32, %c0_i32_0 : i32, i32
  }
  func.func @transform_3(%arg0: i32) -> (i32, i32, i32) {
    %c0_i32 = arith.constant 0 : i32
    %c0_i32_0 = arith.constant 0 : i32
    %c0_i32_1 = arith.constant 0 : i32
    return %arg0, %c0_i32, %c0_i32_0 : i32, i32, i32
  }
}

</mosaic_0001>

<bundles_post_ra>
// kernel: decoder_forward.1
= control target key start
LH: loop header
LB: loop body
LE: loop exit
PB: predicated region body
PF: predicated region fallthrough
CT: control target
= control target key end

     0   :  { %s792_s12 = smov 0   ;;  %s954_s0 = inlined_call_operand.vmem [shape: bf16[4,8,16,256], index: 0, kind: input, shape index: {}]   ;;  %s955_s1 = inlined_call_operand.vmem [shape: f32[256,128], index: 1, kind: input, shape index: {}]   ;;  %s956_s2 = inlined_call_operand.vmem [shape: f32[1,128], index: 2, kind: input, shape index: {}]   ;;  %s957_s3 = inlined_call_operand.vmem [shape: f32[4,16,128], index: 3, kind: output, shape index: {}]  }
   0x1 LB: > { %s485_s13 = sadd.s32 4294967295, %s734_s12   ;;  %p489_p0 = scmp.ge.s32.totalorder %s734_s12, 1  ;;  %s734_s12 = sphi %s792_s12, %s13_s12  }
   0x2   : > { %p139_p1 = scmp.lt.s32.totalorder %s734_s12, 3 }
   0x4   : > { %p140_p2 = pnand %p489_p0, %p139_p1 }
   0x5   : > { %s490_s14 = sshll.u32 (!%p140_p2), %s485_s13, 1  ;;  %s814_s23 = smov (!%p140_p2), 1  }
   0x6   : > { %143 = sbr.rel (%p140_p2) target bundleno = 605 (0x25d), region = 32  ;;  %p166_p3 = scmp.lt.s32.totalorder (!%p140_p2), %s490_s14, 3 }
   0xd   : > { %s965_s14 = smov (!%p166_p3, %s490_s14), 3 }
   0xe   : > { %s501_s15 = sshll.u32 %s965_s14, 7  ;;  %s502_s16 = sshll.u32 %s965_s14, 4 }
   0xf   : > { %s803_s19 = scalar_lea.vmem %s954_s0, %s501_s15  ;;  %s808_s22 = scalar_lea.vmem %s957_s3, %s502_s16 }
  0x10   : > { %v179_v0 = vld [vmem:[%s803_s19] sm:$0xff]  ;;  %v180_v1 = vld [vmem:[%s803_s19 + $0x8] sm:$0xff] }
  0x11   : > { %v181_v2 = vld [vmem:[%s803_s19 + $0x80] sm:$0xff]  ;;  %v182_v3 = vld [vmem:[%s803_s19 + $0x88] sm:$0xff]  ;;  %v183_v4 = vunpack.c.l.bf16 %v179_v0   ;;  %v184_v5 = vunpack.c.h.bf16 %v179_v0   ;;  %v185_v6 = vunpack.c.l.bf16 %v180_v1   ;;  %v186_v7 = vunpack.c.h.bf16 %v180_v1  }
  0x12   : > { %v187_v8 = vunpack.c.l.bf16 %v181_v2   ;;  %v188_v9 = vunpack.c.h.bf16 %v181_v2   ;;  %v189_v10 = vunpack.c.l.bf16 %v182_v3   ;;  %v190_v11 = vunpack.c.h.bf16 %v182_v3  }
  0x13   : > { %v752_v16 = vmov %v186_v7   ;;  %v756_v17 = vmov %v185_v6   ;;  %v760_v18 = vmov %v184_v5   ;;  %v764_v19 = vmov %v183_v4  }
  0x14   : > { %v736_v12 = vmov %v190_v11   ;;  %v740_v13 = vmov %v189_v10   ;;  %v744_v14 = vmov %v188_v9   ;;  %v748_v15 = vmov %v187_v8  }
  0x15 LB: >> { %s503_s24 = sshll.u32 %s770_s23, 4  ;;  %s196_s23 = sadd.s32 1, %s770_s23   ;;  %s770_s23 = sphi %s814_s23, %s196_s23   ;;  %v766_v19 = vphi %v764_v19, %v765_v19   ;;  %v762_v18 = vphi %v760_v18, %v761_v18   ;;  %v758_v17 = vphi %v756_v17, %v757_v17   ;;  %v754_v16 = vphi %v752_v16, %v753_v16   ;;  %v750_v15 = vphi %v748_v15, %v749_v15   ;;  %v746_v14 = vphi %v744_v14, %v745_v14   ;;  %v742_v13 = vphi %v740_v13, %v741_v13   ;;  %v738_v12 = vphi %v736_v12, %v737_v12  }
  0x16   : >> { %s207_s25 = scalar_lea.vmem %s803_s19, %s503_s24  ;;  %p193_p4 = scmp.ge.s32.totalorder %s196_s23, 8  }
  0x17   : >> { %v208_v20 = vld [vmem:[%s207_s25] sm:$0xff]  ;;  %v209_v21 = vld [vmem:[%s207_s25 + $0x8] sm:$0xff]  ;;  %v246_v45 = vld [vmem:[%s955_s1 + $0x90] sm:$0xff] (%p193_p4) }
  0x18   : >> { %v210_v22 = vld [vmem:[%s207_s25 + $0x80] sm:$0xff]  ;;  %v211_v23 = vld [vmem:[%s207_s25 + $0x88] sm:$0xff]  ;;  %v212_v24 = vunpack.c.l.bf16 %v208_v20  ;;  %v213_v25 = vunpack.c.h.bf16 %v208_v20  ;;  %v214_v26 = vunpack.c.l.bf16 %v209_v21  ;;  %v215_v27 = vunpack.c.h.bf16 %v209_v21  ;;  %v247_v46 = vld [vmem:[%s955_s1 + $0x98] sm:$0xff] (%p193_p4) }
  0x19   : >> { %v216_v28 = vunpack.c.l.bf16 %v210_v22  ;;  %v217_v29 = vunpack.c.h.bf16 %v210_v22  ;;  %v218_v30 = vunpack.c.l.bf16 %v211_v23  ;;  %v219_v31 = vunpack.c.h.bf16 %v211_v23  ;;  %195 = sbr.rel (!%p193_p4) target bundleno = 21 (0x15), region = 70  ;;  %v244_v40 = vld [vmem:[%s955_s1 + $0x80] sm:$0xff] (%p193_p4)  ;;  %v245_v41 = vld [vmem:[%s955_s1 + $0x88] sm:$0xff] (%p193_p4)  ;;  %v230_v49 = vld [vmem:[%s955_s1 + $0x10] sm:$0xff] (%p193_p4) }
  0x1a   : >> { %v821_v19 = vmax.f32 %v766_v19, %v212_v24   ;;  %v221_v33 = vmax.f32 %v762_v18, %v213_v25   ;;  %v823_v17 = vmax.f32 %v758_v17, %v214_v26   ;;  %v825_v16 = vmax.f32 %v754_v16, %v215_v27   ;;  %v228_v42 = vld [vmem:[%s955_s1] sm:$0xff] (%p193_p4)  ;;  %v229_v44 = vld [vmem:[%s955_s1 + $0x8] sm:$0xff] (%p193_p4)  ;;  %v231_v50 = vld [vmem:[%s955_s1 + $0x18] sm:$0xff] (%p193_p4) }
  0x1b   : >> { %v827_v15 = vmax.f32 %v750_v15, %v216_v28   ;;  %v225_v37 = vmax.f32 %v746_v14, %v217_v29   ;;  %v829_v13 = vmax.f32 %v742_v13, %v218_v30   ;;  %v831_v12 = vmax.f32 %v738_v12, %v219_v31   ;;  %v248_v51 = vld [vmem:[%s955_s1 + $0xa0] sm:$0xff] (%p193_p4)  ;;  %v249_v52 = vld [vmem:[%s955_s1 + $0xa8] sm:$0xff] (%p193_p4)  ;;  %v250_v57 = vld [vmem:[%s955_s1 + $0xb0] sm:$0xff] (%p193_p4) }
  0x1c   : >> { %v958_v32 = vmov %v821_v19  ;;  %v959_v34 = vmov %v823_v17  ;;  %v960_v35 = vmov %v825_v16  ;;  %v761_v18 = vmov %v221_v33   ;;  %331 = vmatprep.mubr.f32.mxu0 (%p193_p4), %v221_v33  ;;  %v232_v55 = vld [vmem:[%s955_s1 + $0x20] sm:$0xff] (%p193_p4)  ;;  %v233_v56 = vld [vmem:[%s955_s1 + $0x28] sm:$0xff] (%p193_p4)  ;;  %v251_v58 = vld [vmem:[%s955_s1 + $0xb8] sm:$0xff] (%p193_p4) }
  0x1d   : >> { %v961_v36 = vmov %v827_v15  ;;  %v962_v38 = vmov %v829_v13  ;;  %v963_v39 = vmov %v831_v12  ;;  %v745_v14 = vmov %v225_v37   ;;  %341 = vmatprep.mubr.f32.mxu1 (%p193_p4), %v225_v37  ;;  %v234_v61 = vld [vmem:[%s955_s1 + $0x30] sm:$0xff] (%p193_p4)  ;;  %v235_v62 = vld [vmem:[%s955_s1 + $0x38] sm:$0xff] (%p193_p4)  ;;  %v252_v63 = vld [vmem:[%s955_s1 + $0xc0] sm:$0xff] (%p193_p4) }
  0x1e   : >> { %v737_v12 = vmov %v963_v39   ;;  %v741_v13 = vmov %v962_v38   ;;  %v749_v15 = vmov %v961_v36   ;;  %v753_v16 = vmov %v960_v35   ;;  %v253_v0 = vld [vmem:[%s955_s1 + $0xc8] sm:$0xff] (%p193_p4)  ;;  %v236_v3 = vld [vmem:[%s955_s1 + $0x40] sm:$0xff] (%p193_p4)  ;;  %v254_v5 = vld [vmem:[%s955_s1 + $0xd0] sm:$0xff] (%p193_p4) }
  0x1f   : >> { %v757_v17 = vmov %v959_v34   ;;  %v765_v19 = vmov %v958_v32   ;;  %v548_v43 = vpack.c.bf16 (%p193_p4), %v245_v41, %v244_v40  ;;  %v550_v47 = vpack.c.bf16 (%p193_p4), %v229_v44, %v228_v42  ;;  %v237_v4 = vld [vmem:[%s955_s1 + $0x48] sm:$0xff] (%p193_p4)  ;;  %v255_v6 = vld [vmem:[%s955_s1 + $0xd8] sm:$0xff] (%p193_p4)  ;;  %v238_v9 = vld [vmem:[%s955_s1 + $0x50] sm:$0xff] (%p193_p4) }
  0x20   : > { %v552_v48 = vpack.c.bf16 %v247_v46, %v246_v45  ;;  %v554_v53 = vpack.c.bf16 %v231_v50, %v230_v49  ;;  %v556_v54 = vpack.c.bf16 %v249_v52, %v248_v51  ;;  %v558_v59 = vpack.c.bf16 %v233_v56, %v232_v55  ;;  %v239_v10 = vld [vmem:[%s955_s1 + $0x58] sm:$0xff]  ;;  %v256_v11 = vld [vmem:[%s955_s1 + $0xe0] sm:$0xff]  ;;  %v257_v12 = vld [vmem:[%s955_s1 + $0xe8] sm:$0xff] }
  0x21   : > { %549 = vmatprep.subr.bf16.mxu0 %v548_v43  ;;  %580 = vmatprep.subr.bf16.mxu1 %v548_v43  ;;  %v560_v60 = vpack.c.bf16 %v251_v58, %v250_v57  ;;  %v562_v1 = vpack.c.bf16 %v235_v62, %v234_v61  ;;  %v564_v2 = vpack.c.bf16 %v253_v0, %v252_v63  ;;  %v240_v15 = vld [vmem:[%s955_s1 + $0x60] sm:$0xff]  ;;  %v241_v16 = vld [vmem:[%s955_s1 + $0x68] sm:$0xff]  ;;  %v258_v17 = vld [vmem:[%s955_s1 + $0xf0] sm:$0xff] }
  0x22   : > { %551 = vmatpush3.bf16.msra.mxu0 %v550_v47  ;;  %588 = vmatpush3.bf16.msra.mxu1 %v550_v47  ;;  %v566_v7 = vpack.c.bf16 %v237_v4, %v236_v3  ;;  %v568_v8 = vpack.c.bf16 %v255_v6, %v254_v5  ;;  %v570_v13 = vpack.c.bf16 %v239_v10, %v238_v9  ;;  %v259_v18 = vld [vmem:[%s955_s1 + $0xf8] sm:$0xff]  ;;  %v242_v21 = vld [vmem:[%s955_s1 + $0x70] sm:$0xff]  ;;  %v498_v28 = vld [vmem:[%s956_s2] ss:$0 sm:$0xff] }
  0x23   : > { %553 = vmatprep.subr.bf16.mxu0 %v552_v48  ;;  %581 = vmatprep.subr.bf16.mxu1 %v552_v48  ;;  %v572_v14 = vpack.c.bf16 %v257_v12, %v256_v11  ;;  %v574_v19 = vpack.c.bf16 %v241_v16, %v240_v15  ;;  %v576_v20 = vpack.c.bf16 %v259_v18, %v258_v17  ;;  %v243_v22 = vld [vmem:[%s955_s1 + $0x78] sm:$0xff] }
  0x24   : > { %v578_v23 = vpack.c.bf16 %v243_v22, %v242_v21 }
  0x26   : > { %555 = vmatpush3.bf16.msra.mxu0 %v554_v53  ;;  %589 = vmatpush3.bf16.msra.mxu1 %v554_v53 }
  0x27   : > { %557 = vmatprep.subr.bf16.mxu0 %v556_v54  ;;  %582 = vmatprep.subr.bf16.mxu1 %v556_v54 }
  0x2a   : > { %559 = vmatpush3.bf16.msra.mxu0 %v558_v59  ;;  %590 = vmatpush3.bf16.msra.mxu1 %v558_v59 }
  0x2b   : > { %561 = vmatprep.subr.bf16.mxu0 %v560_v60  ;;  %583 = vmatprep.subr.bf16.mxu1 %v560_v60 }
  0x2e   : > { %563 = vmatpush3.bf16.msra.mxu0 %v562_v1  ;;  %591 = vmatpush3.bf16.msra.mxu1 %v562_v1 }
  0x2f   : > { %565 = vmatprep.subr.bf16.mxu0 %v564_v2  ;;  %584 = vmatprep.subr.bf16.mxu1 %v564_v2 }
  0x32   : > { %567 = vmatpush3.bf16.msra.mxu0 %v566_v7  ;;  %592 = vmatpush3.bf16.msra.mxu1 %v566_v7 }
  0x33   : > { %569 = vmatprep.subr.bf16.mxu0 %v568_v8  ;;  %585 = vmatprep.subr.bf16.mxu1 %v568_v8 }
  0x36   : > { %571 = vmatpush3.bf16.msra.mxu0 %v570_v13  ;;  %593 = vmatpush3.bf16.msra.mxu1 %v570_v13 }
  0x37   : > { %573 = vmatprep.subr.bf16.mxu0 %v572_v14  ;;  %586 = vmatprep.subr.bf16.mxu1 %v572_v14 }
  0x3a   : > { %575 = vmatpush3.bf16.msra.mxu0 %v574_v19  ;;  %594 = vmatpush3.bf16.msra.mxu1 %v574_v19 }
  0x3b   : > { %577 = vmatprep.subr.bf16.mxu0 %v576_v20  ;;  %587 = vmatprep.subr.bf16.mxu1 %v576_v20 }
  0x3e   : > { %579 = vmatpush3.bf16.msra.mxu0 %v578_v23  ;;  %595 = vmatpush3.bf16.msra.mxu1 %v578_v23 }
  0x41   : > { %332 = vmatmul.mubr.f32.vlgmr.msra.gmra.mrb[0].mxu0 %v958_v32  ;;  %342 = vmatmul.mubr.f32.vlgmr.msra.gmra.mrb[0].mxu1 %v961_v36 }
  0x42   : > { %336 = vmatprep.mubr.f32.mxu0 %v960_v35  ;;  %346 = vmatprep.mubr.f32.mxu1 %v963_v39 }
  0x45   : > { %337 = vmatmul.mubr.f32.gmra.mrb[2].mxu0 %v959_v34  ;;  %347 = vmatmul.mubr.f32.gmra.mrb[2].mxu1 %v962_v38 }
 0x114   : > { %v536_v24 = vpop.f32.mrb[0].mxu0  ;;  %v542_v25 = vpop.f32.mrb[0].mxu1 }
 0x115   : > { %v537_v26 = vpop.f32.mrb[1].mxu0  ;;  %v543_v27 = vpop.f32.mrb[1].mxu1 }
 0x116   : > { %v538_v29 = vadd.f32 %v537_v26, %v536_v24  ;;  %v544_v30 = vadd.f32 %v543_v27, %v542_v25 }
 0x118   : > { %v539_v31 = vpop.f32.mrb[2].mxu0  ;;  %v545_v32 = vpop.f32.mrb[2].mxu1  ;;  %v344_v33 = vadd.f32 %v544_v30, %v498_v28  ;;  %v334_v35 = vadd.f32 %v538_v29, %v498_v28 }
 0x119   : > { %v540_v36 = vpop.f32.mrb[3].mxu0  ;;  %v546_v37 = vpop.f32.mrb[3].mxu1 }
 0x11a   : > { %v541_v39 = vadd.f32 %v540_v36, %v539_v31  ;;  %v547_v34 = vadd.f32 %v546_v37, %v545_v32  ;;  %356 = vmax.xlane.f32.xlu1 %v344_v33  ;;  %352 = vmax.xlane.f32.xlu0 %v334_v35 }
 0x11c   : > { %v349_v38 = vadd.f32 %v547_v34, %v498_v28  ;;  %v339_v40 = vadd.f32 %v541_v39, %v498_v28 }
 0x11e   : > { %358 = vmax.xlane.f32.xlu1 %v349_v38  ;;  %354 = vmax.xlane.f32.xlu0 %v339_v40 }
 0x1a7   : > { %v357_v41 = vpop.xlane.xlu1 %356  ;;  %v353_v42 = vpop.xlane.xlu0 %352 }
 0x1a8   : > { %v362_v43 = vsub.f32 %v344_v33, %v357_v41  ;;  %v360_v44 = vsub.f32 %v334_v35, %v353_v42 }
 0x1aa   : > { %v364_v45 = vmul.f32 1.442695, %v360_v44  ;;  %v368_v48 = vmul.f32 1.442695, %v362_v43 }
 0x1ab   : > { %v359_v46 = vpop.xlane.xlu1 %358  ;;  %v355_v47 = vpop.xlane.xlu0 %354 }
 0x1ac   : > { %v361_v49 = vsub.f32 %v339_v40, %v355_v47  ;;  %676 = vpow2.f32 %v364_v45  ;;  %v363_v50 = vsub.f32 %v349_v38, %v359_v46 }
 0x1ad   : > { %678 = vpow2.f32 %v368_v48 }
 0x1ae   : > { %v366_v51 = vmul.f32 1.442695, %v361_v49  ;;  %v370_v52 = vmul.f32 1.442695, %v363_v50 }
 0x1b0   : > { %680 = vpow2.f32 %v366_v51 }
 0x1b1   : > { %682 = vpow2.f32 %v370_v52 }
 0x1b6   : > { %v677_v53 = vpop.eup %676 }
 0x1b7   : > { %372 = vadd.xlane.f32.xlu0 %v677_v53  ;;  %v679_v54 = vpop.eup %678 }
 0x1ba   : > { %v681_v55 = vpop.eup %680 }
 0x1bb   : > { %376 = vadd.xlane.f32.xlu0 %v679_v54  ;;  %374 = vadd.xlane.f32.xlu1 %v681_v55  ;;  %v683_v56 = vpop.eup %682 }
 0x1bf   : > { %378 = vadd.xlane.f32.xlu1 %v683_v56 }
 0x244   : > { %v373_v57 = vpop.xlane.xlu0 %372 }
 0x245   : > { %684 = vlog2.f32 %v373_v57 }
 0x248   : > { %v375_v58 = vpop.xlane.xlu1 %374  ;;  %v377_v59 = vpop.xlane.xlu0 %376 }
 0x249   : > { %686 = vlog2.f32 %v375_v58 }
 0x24a   : > { %688 = vlog2.f32 %v377_v59 }
 0x24c   : > { %v379_v60 = vpop.xlane.xlu1 %378 }
 0x24d   : > { %690 = vlog2.f32 %v379_v60 }
 0x24f   : > { %v685_v61 = vpop.eup %684 }
 0x250   : > { %v381_v62 = vmul.f32 0.6931472, %v685_v61 }
 0x252   : > { %v388_v63 = vsub.f32 %v360_v44, %v381_v62 }
 0x253   : > { %v687_v0 = vpop.eup %686 }
 0x254   : > { %v689_v1 = vpop.eup %688  ;;  %392 = vst [vmem:[%s808_s22] sm:$0xff] %v388_v63  ;;  %v383_v2 = vmul.f32 0.6931472, %v687_v0 }
 0x255   : > { %v385_v3 = vmul.f32 0.6931472, %v689_v1 }
 0x256   : > { %v389_v4 = vsub.f32 %v361_v49, %v383_v2 }
 0x257   : > { %v691_v5 = vpop.eup %690  ;;  %v390_v6 = vsub.f32 %v362_v43, %v385_v3 }
 0x258   : > { %393 = vst [vmem:[%s808_s22 + $0x8] sm:$0xff] %v389_v4  ;;  %v387_v7 = vmul.f32 0.6931472, %v691_v5 }
 0x259   : > { %394 = vst [vmem:[%s808_s22 + $0x10] sm:$0xff] %v390_v6 }
 0x25a   : > { %v391_v8 = vsub.f32 %v363_v50, %v387_v7 }
 0x25c   : > { %395 = vst [vmem:[%s808_s22 + $0x18] sm:$0xff] %v391_v8 }
 0x25d PF: > { %s13_s12 = sadd.s32 1, %s734_s12  }
 0x25e   : > { %p10_p5 = scmp.ge.s32.totalorder %s13_s12, 4  }
 0x260   :  { %12 = sbr.rel (!%p10_p5) target bundleno = 1 (0x1), region = 81 }

</bundles_post_ra>
